<compile_context>
chip_gen: v5e
topology: v5e:2x2
jax: 0.10.0
libtpu: 0.0.40
codegen_flags: <defaults>
</compile_context>

<pallas_src>
import functools

import jax
import jax.numpy as jnp
from jax import lax
from jax.experimental import pallas as pl
from jax.experimental.pallas import tpu as pltpu


_SQRT_HALF = 0.7071067811865476


def _round_up(x, m):
    return (x + m - 1) // m * m


def _cdiv(a, b):
    return -(-a // b)


def _vmem_budget():
    """(tile-selection target, vmem_limit cap), generation dependent."""
    cap = 64 << 20
    try:
        cap = int(pltpu.get_tpu_info().vmem_capacity_bytes)
    except Exception:
        pass
    if cap >= (100 << 20):          # v5e / v6e: 128 MiB per TensorCore
        return 96 << 20, 110 << 20
    return 40 << 20, 52 << 20       # v7x: 64 MiB per TensorCore


def _num_tensorcores():
    try:
        info = pltpu.get_tpu_info()
    except Exception:
        return 1
    for name in ("num_cores", "core_count", "cores_per_chip",
                 "num_tensorcores", "tensorcore_count"):
        v = getattr(info, name, None)
        if isinstance(v, int) and v > 0:
            return v
    return 1          # unknown -> assume 1 TC (no forced row split)


def _ffn_kernel(x_ref, w1_ref, b1_ref, w2_ref, b2_ref, o_ref):
    # x_ref : (tm, H) bf16   w1_ref: (H, tk) bf16   b1_ref: (1, tk) f32
    # w2_ref: (tk, H) bf16   b2_ref: (1, H)  f32    o_ref : (tm, H) f32
    # o_ref's block index ignores k, so it is the resident f32 accumulator.
    k = pl.program_id(1)

    @pl.when(k == 0)
    def _():
        o_ref[...] = jnp.broadcast_to(
            b2_ref[...].astype(o_ref.dtype), o_ref.shape)

    # lin1 on this F-chunk: bf16 operands, f32 accumulation on the MXU.
    h = jnp.dot(x_ref[...], w1_ref[...], preferred_element_type=jnp.float32)
    h = h + b1_ref[...]

    # exact (erf-based) GELU in f32 -- matches torch.nn.GELU() default.
    h = 0.5 * h * (1.0 + lax.erf(h * jnp.float32(_SQRT_HALF)))

    # lin2 partial product for this F-chunk, accumulated into the output.
    o_ref[...] += jnp.dot(h.astype(w2_ref.dtype), w2_ref[...],
                          preferred_element_type=jnp.float32)


def _vmem_bytes(tm, tk, h, op_bytes):
    dbl = 2  # Pallas double-buffers every pipelined block
    ins = dbl * (op_bytes * tm * h          # x tile
                 + op_bytes * h * tk        # W1 chunk
                 + 4 * tk                   # b1 chunk (f32)
                 + op_bytes * tk * h        # W2 chunk
                 + 4 * h)                   # b2 (f32)
    outs = dbl * 4 * tm * h                 # f32 output/accumulator block
    interm = tm * tk * (4 + op_bytes) + 4 * tm * h   # GELU f32 + bf16 cast copy
    return ins + outs + interm


def _select_tk(f_128, tk_cap):
    """Largest 128-multiple chunk <= tk_cap whose last-chunk padding wastes
    <= 6.25% of F-lanes (tk=128 => zero waste)."""
    tk_cap = max(128, (min(tk_cap, f_128) // 128) * 128)
    for tk in range(tk_cap, 127, -128):
        pad = _cdiv(f_128, tk) * tk - f_128
        if 16 * pad <= f_128:
            return tk
    return 128


def _select_tiles(n_pad, h_pad, f_128, tm_req, tk_req, target, op_bytes,
                  n_cores):
    tm = min(max(128, _round_up(tm_req, 128)), n_pad)
    # Guarantee >= 2 blocks on the parallel axis when >= 2 TensorCores exist.
    if n_cores >= 2 and n_pad >= 256:
        tm = min(tm, _round_up(_cdiv(n_pad, 2), 128))
    tk = _select_tk(f_128, tk_req)
    # Shrink the streamed F-chunk first, then the row tile, until the
    # double-buffered working set fits the generation-dependent target.
    while tk > 128 and _vmem_bytes(tm, tk, h_pad, op_bytes) > target:
        tk = _select_tk(f_128, tk - 128)
    while tm > 128 and _vmem_bytes(tm, tk, h_pad, op_bytes) > target:
        tm = max(128, _round_up(tm // 2, 128))
    return tm, tk


@functools.partial(jax.jit, static_argnames=("tm", "tk", "vmem_limit"))
def _ffn_pallas(x2d, w1_t, b1, w2_t, b2, *, tm, tk, vmem_limit):
    n, h = x2d.shape
    f = w1_t.shape[1]          # already padded to a whole number of tk chunks
    grid = (_cdiv(n, tm), f // tk)
    n_row_tiles = grid[0]
    op_bytes = x2d.dtype.itemsize

    cost = pl.CostEstimate(
        flops=4 * n * h * f,                 # two matmuls, 2 flops / MAC
        transcendentals=n * f,               # erf per GELU element
        bytes_accessed=(op_bytes * n * h + 4 * n * h
                        + n_row_tiles * (2 * op_bytes * h * f + 4 * f)
                        + 4 * h),
    )

    return pl.pallas_call(
        _ffn_kernel,
        out_shape=jax.ShapeDtypeStruct((n, h), jnp.float32),
        grid=grid,
        in_specs=[
            pl.BlockSpec((tm, h), lambda i, k: (i, 0)),   # x row tile
            pl.BlockSpec((h, tk), lambda i, k: (0, k)),   # W1^T F-chunk
            pl.BlockSpec((1, tk), lambda i, k: (0, k)),   # b1 F-chunk
            pl.BlockSpec((tk, h), lambda i, k: (k, 0)),   # W2^T F-chunk
            pl.BlockSpec((1, h), lambda i, k: (0, 0)),    # b2
        ],
        out_specs=pl.BlockSpec((tm, h), lambda i, k: (i, 0)),  # resident over k
        compiler_params=pltpu.CompilerParams(
            dimension_semantics=("parallel", "arbitrary"),
            vmem_limit_bytes=vmem_limit,
        ),
        cost_estimate=cost,
    )(x2d, w1_t, b1, w2_t, b2)


def ffn_forward(x, params, *, tm=512, tk=2048, compute_dtype=jnp.bfloat16):
    """x: (..., hidden_dim) -> (..., hidden_dim), matching FFNNetwork.forward."""
    w1_t, b1, w2_t, b2 = params
    h = x.shape[-1]
    f = w1_t.shape[1]
    lead = x.shape[:-1]
    out_dtype = x.dtype

    x2d = x.reshape(-1, h)
    n = x2d.shape[0]

    # Lane-dense, MXU-friendly padding (exact: see header comment).
    h_pad = _round_up(h, 128)
    f_128 = _round_up(f, 128)
    n_pad = _round_up(n, 128)

    target, limit_cap = _vmem_budget()
    op_bytes = jnp.dtype(compute_dtype).itemsize
    tm, tk = _select_tiles(n_pad, h_pad, f_128, tm, tk, target, op_bytes,
                           _num_tensorcores())
    f_pad = _cdiv(f_128, tk) * tk   # whole number of streamed chunks (<=6% pad)

    if n_pad != n or h_pad != h:
        x2d = jnp.pad(x2d, ((0, n_pad - n), (0, h_pad - h)))
    if h_pad != h or f_pad != f:
        w1_t = jnp.pad(w1_t, ((0, h_pad - h), (0, f_pad - f)))
        b1 = jnp.pad(b1, ((0, 0), (0, f_pad - f)))
        w2_t = jnp.pad(w2_t, ((0, f_pad - f), (0, h_pad - h)))
        b2 = jnp.pad(b2, ((0, 0), (0, h_pad - h)))

    # bf16 MXU fast path: operands bf16, accumulation f32, biases f32.
    x2d = x2d.astype(compute_dtype)
    w1_t = w1_t.astype(compute_dtype)
    w2_t = w2_t.astype(compute_dtype)
    b1 = b1.astype(jnp.float32)
    b2 = b2.astype(jnp.float32)

    vmem_limit = int(min(limit_cap,
                         max(32 << 20,
                             2 * _vmem_bytes(tm, tk, h_pad, op_bytes))))

    out2d = _ffn_pallas(x2d, w1_t, b1, w2_t, b2,
                        tm=tm, tk=tk, vmem_limit=vmem_limit)
    return out2d[:n, :h].astype(out_dtype).reshape(*lead, h)


def init_ffn_params(key, hidden_dim, ffn_dim, dtype=jnp.float32):
    """Mimics nn.Linear.reset_parameters(): U(-1/sqrt(fan_in), 1/sqrt(fan_in)).
    Weights stored transposed as (in_features, out_features)."""
    k1, k2, k3, k4 = jax.random.split(key, 4)
    bound1 = 1.0 / jnp.sqrt(hidden_dim)
    bound2 = 1.0 / jnp.sqrt(ffn_dim)
    w1_t = jax.random.uniform(k1, (hidden_dim, ffn_dim), dtype, -bound1, bound1)
    b1 = jax.random.uniform(k2, (1, ffn_dim), dtype, -bound1, bound1)
    w2_t = jax.random.uniform(k3, (ffn_dim, hidden_dim), dtype, -bound2, bound2)
    b2 = jax.random.uniform(k4, (1, hidden_dim), dtype, -bound2, bound2)
    return w1_t, b1, w2_t, b2


def _reference(x, params):
    w1_t, b1, w2_t, b2 = params
    h = x @ w1_t + b1[0]
    h = jax.nn.gelu(h, approximate=False)
    return h @ w2_t + b2[0]


if __name__ == "__main__":
    key = jax.random.PRNGKey(0)

    # --- small test (module-typical toy dims) ---------------------------------
    hidden_dim, ffn_dim = 32, 64
    batch, seq = 2, 8
    kp, kx, key = jax.random.split(key, 3)
    params = init_ffn_params(kp, hidden_dim, ffn_dim)
    x = jax.random.normal(kx, (batch, seq, hidden_dim), jnp.float32)

    out = jax.block_until_ready(ffn_forward(x, params))
    ref = _reference(x, params)
    assert out.shape == x.shape
    err = float(jnp.max(jnp.abs(out - ref)))
    assert jnp.allclose(out, ref, atol=2e-2, rtol=2e-2), err

    # --- medium test: multiple streamed F-chunks, ragged-F padding, >1 row tile
    hidden_dim, ffn_dim = 192, 2050
    batch, seq = 3, 70
    kp, kx = jax.random.split(key)
    params = init_ffn_params(kp, hidden_dim, ffn_dim)
    x = jax.random.normal(kx, (batch, seq, hidden_dim), jnp.float32)

    out = jax.block_until_ready(ffn_forward(x, params))
    ref = _reference(x, params)
    assert out.shape == x.shape
    err = float(jnp.max(jnp.abs(out - ref)))
    # bf16 MXU operands vs. f32 reference: looser (but still tight) tolerance.
    assert jnp.allclose(out, ref, atol=6e-2, rtol=6e-2), err

    print("KERNEL_OK")
</pallas_src>

<mosaic_0001>
module attributes {stable_mosaic.version = 11 : i64} {
  func.func @_ffn_kernel(%arg0: i32, %arg1: i32, %arg2: memref<128x128xbf16, #tpu.memory_space<vmem>>, %arg3: memref<128x128xbf16, #tpu.memory_space<vmem>>, %arg4: memref<1x128xf32, #tpu.memory_space<vmem>>, %arg5: memref<128x128xbf16, #tpu.memory_space<vmem>>, %arg6: memref<1x128xf32, #tpu.memory_space<vmem>>, %arg7: memref<128x128xf32, #tpu.memory_space<vmem>>) attributes {dimension_semantics = [#tpu.dimension_semantics<parallel>, #tpu.dimension_semantics<arbitrary>], iteration_bounds = array<i64: 1, 1>, scalar_prefetch = 0 : i64, scratch_operands = 0 : i64, tpu.core_type = #tpu.core_type<tc>, window_params = [{transform_indices = @transform_0, window_bounds = array<i64: 128, 128>}, {transform_indices = @transform_1, window_bounds = array<i64: 128, 128>}, {transform_indices = @transform_2, window_bounds = array<i64: 1, 128>}, {transform_indices = @transform_3, window_bounds = array<i64: 128, 128>}, {pipeline_mode = #tpu.pipeline_mode<synchronous>, transform_indices = @transform_4, window_bounds = array<i64: 1, 128>}, {transform_indices = @transform_5, window_bounds = array<i64: 128, 128>}]} {
    %c0_i32 = arith.constant 0 : i32
    %0 = arith.cmpi eq, %arg1, %c0_i32 : i32
    %1 = arith.extui %0 : i1 to i32
    %c0_i32_0 = arith.constant 0 : i32
    %2 = arith.cmpi ne, %1, %c0_i32_0 : i32
    scf.if %2 {
      %c0_16 = arith.constant 0 : index
      %c0_17 = arith.constant 0 : index
      %23 = vector.load %arg6[%c0_16, %c0_17] : memref<1x128xf32, #tpu.memory_space<vmem>>, vector<1x128xf32>
      %24 = vector.shape_cast %23 : vector<1x128xf32> to vector<1x128xf32>
      %25 = vector.broadcast %24 : vector<1x128xf32> to vector<128x128xf32>
      %c0_18 = arith.constant 0 : index
      %c0_19 = arith.constant 0 : index
      %26 = vector.load %arg7[%c0_18, %c0_19] : memref<128x128xf32, #tpu.memory_space<vmem>>, vector<128x128xf32>
      tpu.vector_store %arg7[%c0_18, %c0_19], %25 {strides = array<i32>} : memref<128x128xf32, #tpu.memory_space<vmem>>, vector<128x128xf32>,
    } else {
    }
    %c0 = arith.constant 0 : index
    %c0_1 = arith.constant 0 : index
    %3 = vector.load %arg2[%c0, %c0_1] : memref<128x128xbf16, #tpu.memory_space<vmem>>, vector<128x128xbf16>
    %c0_2 = arith.constant 0 : index
    %c0_3 = arith.constant 0 : index
    %4 = vector.load %arg3[%c0_2, %c0_3] : memref<128x128xbf16, #tpu.memory_space<vmem>>, vector<128x128xbf16>
    %cst = arith.constant dense<0.000000e+00> : vector<128x128xf32>
    %5 = tpu.matmul %3, %4, %cst {dimension_numbers = #tpu.dot_dimension_numbers<[1], [0], [0], [1], [0, 0, 1, 1], [], []>} : vector<128x128xbf16>, vector<128x128xbf16>, vector<128x128xf32> -> vector<128x128xf32>
    %c0_4 = arith.constant 0 : index
    %c0_5 = arith.constant 0 : index
    %6 = vector.load %arg4[%c0_4, %c0_5] : memref<1x128xf32, #tpu.memory_space<vmem>>, vector<1x128xf32>
    %7 = vector.broadcast %6 : vector<1x128xf32> to vector<128x128xf32>
    %8 = arith.addf %5, %7 : vector<128x128xf32>
    %cst_6 = arith.constant 5.000000e-01 : f32
    %9 = vector.broadcast %cst_6 : f32 to vector<128x128xf32>
    %10 = arith.mulf %9, %8 : vector<128x128xf32>
    %cst_7 = arith.constant 0.707106769 : f32
    %11 = vector.broadcast %cst_7 : f32 to vector<128x128xf32>
    %12 = arith.mulf %8, %11 : vector<128x128xf32>
    %13 = math.erf %12 : vector<128x128xf32>
    %cst_8 = arith.constant 1.000000e+00 : f32
    %14 = vector.broadcast %cst_8 : f32 to vector<128x128xf32>
    %15 = arith.addf %14, %13 : vector<128x128xf32>
    %16 = arith.mulf %10, %15 : vector<128x128xf32>
    %c0_9 = arith.constant 0 : index
    %c0_10 = arith.constant 0 : index
    %17 = vector.load %arg7[%c0_9, %c0_10] : memref<128x128xf32, #tpu.memory_space<vmem>>, vector<128x128xf32>
    %18 = arith.truncf %16 : vector<128x128xf32> to vector<128x128xbf16>
    %c0_11 = arith.constant 0 : index
    %c0_12 = arith.constant 0 : index
    %19 = vector.load %arg5[%c0_11, %c0_12] : memref<128x128xbf16, #tpu.memory_space<vmem>>, vector<128x128xbf16>
    %cst_13 = arith.constant dense<0.000000e+00> : vector<128x128xf32>
    %20 = tpu.matmul %18, %19, %cst_13 {dimension_numbers = #tpu.dot_dimension_numbers<[1], [0], [0], [1], [0, 0, 1, 1], [], []>} : vector<128x128xbf16>, vector<128x128xbf16>, vector<128x128xf32> -> vector<128x128xf32>
    %21 = arith.addf %17, %20 : vector<128x128xf32>
    %c0_14 = arith.constant 0 : index
    %c0_15 = arith.constant 0 : index
    %22 = vector.load %arg7[%c0_14, %c0_15] : memref<128x128xf32, #tpu.memory_space<vmem>>, vector<128x128xf32>
    tpu.vector_store %arg7[%c0_14, %c0_15], %21 {strides = array<i32>} : memref<128x128xf32, #tpu.memory_space<vmem>>, vector<128x128xf32>,
    return
  }
  func.func @transform_0(%arg0: i32, %arg1: i32) -> (i32, i32) {
    %c0_i32 = arith.constant 0 : i32
    %c0_i32_0 = arith.constant 0 : i32
    return %arg0, %c0_i32 : i32, i32
  }
  func.func @transform_1(%arg0: i32, %arg1: i32) -> (i32, i32) {
    %c0_i32 = arith.constant 0 : i32
    %c0_i32_0 = arith.constant 0 : i32
    return %c0_i32, %arg1 : i32, i32
  }
  func.func @transform_2(%arg0: i32, %arg1: i32) -> (i32, i32) {
    %c0_i32 = arith.constant 0 : i32
    %c0_i32_0 = arith.constant 0 : i32
    return %c0_i32, %arg1 : i32, i32
  }
  func.func @transform_3(%arg0: i32, %arg1: i32) -> (i32, i32) {
    %c0_i32 = arith.constant 0 : i32
    %c0_i32_0 = arith.constant 0 : i32
    return %arg1, %c0_i32 : i32, i32
  }
  func.func @transform_4(%arg0: i32, %arg1: i32) -> (i32, i32) {
    %c0_i32 = arith.constant 0 : i32
    %c0_i32_0 = arith.constant 0 : i32
    %c0_i32_1 = arith.constant 0 : i32
    return %c0_i32, %c0_i32_0 : i32, i32
  }
  func.func @transform_5(%arg0: i32, %arg1: i32) -> (i32, i32) {
    %c0_i32 = arith.constant 0 : i32
    %c0_i32_0 = arith.constant 0 : i32
    return %arg0, %c0_i32 : i32, i32
  }
}

</mosaic_0001>

<bundles_post_ra>
// kernel: _ffn_pallas.1
= control target key start
LH: loop header
LB: loop body
LE: loop exit
PB: predicated region body
PF: predicated region fallthrough
CT: control target
= control target key end

     0   :  { %10 = vsyncpa [#allocation3], 0  ;;  %s2178_s0 = inlined_call_operand.hbm [shape: bf16[128,128], index: 0, kind: input, shape index: {}]   ;;  %s2179_s1 = inlined_call_operand.hbm [shape: bf16[128,128], index: 1, kind: input, shape index: {}]   ;;  %s2180_s2 = inlined_call_operand.vmem [shape: f32[1,128], index: 2, kind: input, shape index: {}]   ;;  %s2181_s3 = inlined_call_operand.hbm [shape: bf16[128,128], index: 3, kind: input, shape index: {}]   ;;  %s2182_s4 = inlined_call_operand.vmem [shape: f32[1,128], index: 4, kind: input, shape index: {}]   ;;  %s2183_s5 = inlined_call_operand.hbm [shape: f32[128,128], index: 5, kind: output, shape index: {}]  }
   0x1   :  { %11 = vsyncpa [#allocation6], 0 }
   0x2   :  { %12 = vsyncpa [#allocation4], 0  ;;  %s30_s20 = sshll.u32 %s2179_s1, 4  ;;  %s1462_s21 = smov [#allocation5]   ;;  %s31_s20 = int_to_ptr.hbm [resolvable:$true] %s30_s20 }
   0x3   :  { %s32_s22 = sshll.u32 %s1462_s21, 4  ;;  %s17_s25 = sshll.u32 %s2178_s0, 4  ;;  %s33_s22 = int_to_ptr.vmem [resolvable:$true] %s32_s22  ;;  %s18_s25 = int_to_ptr.hbm [resolvable:$true] %s17_s25 }
   0x4   :  { %s1463_s26 = smov 64   ;;  %s1464_s27 = smov 4  }
   0x5   :  { %38 = dma.hbm_to_vmem [thread:$0]  %s31_s20, 1024, %s33_s22, [#allocation6], %s1463_s26, %s1463_s26, %s1464_s27  }
   0x6   :  { %s1465_s28 = smov [#allocation2]   ;;  %s45_s7 = sshll.u32 %s2181_s3, 4  ;;  %s46_s7 = int_to_ptr.hbm [resolvable:$true] %s45_s7 }
   0x7   :  { %s19_s29 = sshll.u32 %s1465_s28, 4  ;;  %s1466_s1 = smov [#allocation7]   ;;  %s20_s29 = int_to_ptr.vmem [resolvable:$true] %s19_s29 }
   0x8   :  { %25 = dma.hbm_to_vmem [thread:$0]  %s18_s25, 1024, %s20_s29, [#allocation3], %s1463_s26, %s1463_s26, %s1464_s27  }
   0x9   :  { %s47_s8 = sshll.u32 %s1466_s1, 4  ;;  %s48_s8 = int_to_ptr.vmem [resolvable:$true] %s47_s8 }
   0xa   :  { %53 = dma.hbm_to_vmem [thread:$0]  %s46_s7, 1024, %s48_s8, [#allocation6], %s1463_s26, %s1463_s26, %s1464_s27  }
   0xb   :  { %1456 = dma.done.wait [#allocation3], 1024  }
   0xc   :  { %1457 = vsyncadd [#allocation3], 4294966272 }
   0xd   :  { %1458 = dma.done.wait [#allocation6], 2048  }
   0xe   :  { %1459 = vsyncadd [#allocation6], 4294965248  ;;  %v1293_v0 = vld [vmem:[#allocation5 + $0x38] sm:$0xff]  ;;  %v1292_v1 = vld [vmem:[#allocation5 + $0x30] sm:$0xff]  ;;  %s1152_s13 = sshll.u32 %s2183_s5, 4  ;;  %s1468_s14 = smov 128   ;;  %s1153_s13 = int_to_ptr.hbm [resolvable:$true] %s1152_s13 }
   0xf   :  { %224 = vmatpush.bf16.msra.mxu0 %v1293_v0  ;;  %1302 = vmatpush.bf16.msra.mxu2 %v1293_v0  ;;  %v1291_v2 = vld [vmem:[#allocation5 + $0x28] sm:$0xff]  ;;  %v1290_v3 = vld [vmem:[#allocation5 + $0x20] sm:$0xff]  ;;  %v1289_v4 = vld [vmem:[#allocation5 + $0x18] sm:$0xff]  ;;  %s1469_s15 = smov 8  }
  0x10   :  { %v1288_v5 = vld [vmem:[#allocation5 + $0x10] sm:$0xff]  ;;  %v1287_v6 = vld [vmem:[#allocation5 + $0x8] sm:$0xff]  ;;  %v1286_v7 = vld [vmem:[#allocation5] sm:$0xff] }
  0x11   :  { %v1278_v8 = vld [vmem:[#allocation2] sm:$0xff]  ;;  %v1279_v10 = vld [vmem:[#allocation2 + $0x8] sm:$0xff]  ;;  %v1280_v12 = vld [vmem:[#allocation2 + $0x10] sm:$0xff] }
  0x12   :  { %v1282_v9 = vld [vmem:[#allocation2 + $0x20] sm:$0xff]  ;;  %v1283_v11 = vld [vmem:[#allocation2 + $0x28] sm:$0xff]  ;;  %v1284_v13 = vld [vmem:[#allocation2 + $0x30] sm:$0xff] }
  0x13   :  { %225 = vmatpush.bf16.msra.mxu0 %v1292_v1  ;;  %1303 = vmatpush.bf16.msra.mxu2 %v1292_v1  ;;  %v1281_v14 = vld [vmem:[#allocation2 + $0x18] sm:$0xff]  ;;  %v1512_v16 = vld [vmem:[%s2180_s2] ss:$0 sm:$0xff]  ;;  %v1300_v22 = vld [vmem:[#allocation7 + $0x30] sm:$0xff] }
  0x14   :  { %v1285_v15 = vld [vmem:[#allocation2 + $0x38] sm:$0xff]  ;;  %v1299_v30 = vld [vmem:[#allocation7 + $0x28] sm:$0xff]  ;;  %v1298_v38 = vld [vmem:[#allocation7 + $0x20] sm:$0xff] }
  0x15   :  { %v1301_v19 = vld [vmem:[#allocation7 + $0x38] sm:$0xff]  ;;  %v1296_v57 = vld [vmem:[#allocation7 + $0x10] sm:$0xff] }
  0x16   :  { %1065 = vmatpush.bf16.msra.mxu1 %v1301_v19  ;;  %1310 = vmatpush.bf16.msra.mxu3 %v1301_v19  ;;  %v1297_v48 = vld [vmem:[#allocation7 + $0x18] sm:$0xff] }
  0x17   :  { %226 = vmatpush.bf16.msra.mxu0 %v1291_v2  ;;  %1304 = vmatpush.bf16.msra.mxu2 %v1291_v2 }
  0x1a   :  { %1066 = vmatpush.bf16.msra.mxu1 %v1300_v22  ;;  %1311 = vmatpush.bf16.msra.mxu3 %v1300_v22 }
  0x1b   :  { %227 = vmatpush.bf16.msra.mxu0 %v1290_v3  ;;  %1305 = vmatpush.bf16.msra.mxu2 %v1290_v3 }
  0x1e   :  { %1067 = vmatpush.bf16.msra.mxu1 %v1299_v30  ;;  %1312 = vmatpush.bf16.msra.mxu3 %v1299_v30 }
  0x1f   :  { %228 = vmatpush.bf16.msra.mxu0 %v1289_v4  ;;  %1306 = vmatpush.bf16.msra.mxu2 %v1289_v4  ;;  %v1295_v4 = vld [vmem:[#allocation7 + $0x8] sm:$0xff] }
  0x22   :  { %1068 = vmatpush.bf16.msra.mxu1 %v1298_v38  ;;  %1313 = vmatpush.bf16.msra.mxu3 %v1298_v38 }
  0x23   :  { %229 = vmatpush.bf16.msra.mxu0 %v1288_v5  ;;  %1307 = vmatpush.bf16.msra.mxu2 %v1288_v5 }
  0x26   :  { %1069 = vmatpush.bf16.msra.mxu1 %v1297_v48  ;;  %1314 = vmatpush.bf16.msra.mxu3 %v1297_v48 }
  0x27   :  { %230 = vmatpush.bf16.msra.mxu0 %v1287_v6  ;;  %1308 = vmatpush.bf16.msra.mxu2 %v1287_v6 }
  0x2a   :  { %1070 = vmatpush.bf16.msra.mxu1 %v1296_v57  ;;  %1315 = vmatpush.bf16.msra.mxu3 %v1296_v57 }
  0x2b   :  { %231 = vmatpush.bf16.msra.mxu0 %v1286_v7  ;;  %1309 = vmatpush.bf16.msra.mxu2 %v1286_v7 }
  0x2e   :  { %232 = vmatmul.bf16.vlgmr.msra.gmra.mxu0 %v1278_v8  ;;  %252 = vmatmul.bf16.vlgmr.msra.gmra.mxu2 %v1282_v9 }
  0x2f   :  { %1071 = vmatpush.bf16.msra.mxu1 %v1295_v4  ;;  %1316 = vmatpush.bf16.msra.mxu3 %v1295_v4 }
  0x3e   :  { %237 = vmatmul.bf16.gmra.mxu0 %v1279_v10  ;;  %257 = vmatmul.bf16.gmra.mxu2 %v1283_v11 }
  0x4e   :  { %242 = vmatmul.bf16.gmra.mxu0 %v1280_v12  ;;  %262 = vmatmul.bf16.gmra.mxu2 %v1284_v13 }
  0x5e   :  { %247 = vmatmul.bf16.gmra.mxu0 %v1281_v14  ;;  %267 = vmatmul.bf16.gmra.mxu2 %v1285_v15  ;;  %v1294_v14 = vld [vmem:[#allocation7] sm:$0xff] }
  0x5f   :  { %1072 = vmatpush.bf16.msra.mxu1 %v1294_v14  ;;  %1317 = vmatpush.bf16.msra.mxu3 %v1294_v14 }
  0xab   :  { %v233_v17 = vpop.f32.mrf.mxu0 }
  0xac   :  { %v1515_v18 = vadd.f32 %v1512_v16, %v233_v17 }
  0xae   :  { %v1518_v20 = vmul.f32 0.70710677, %v1515_v18 }
  0xb0   :  { %v305_v21 = vmul.f32 %v1518_v20, %v1518_v20 }
  0xb1   :  { %v253_v23 = vpop.f32.mrf.mxu2 }
  0xb2   :  { %v1522_v24 = vmin.f32 %v305_v21, 16.0  ;;  %v1525_v25 = vadd.f32 %v1512_v16, %v253_v23 }
  0xb3   :  { %v235_v26 = vpop.f32.mrf.mxu0 }
  0xb4   :  { %v307_v27 = vmul.f32 2.1237322e-06, %v1522_v24  ;;  %v1529_v28 = vmul.f32 0.70710677, %v1525_v25  ;;  %v1532_v29 = vadd.f32 %v1512_v16, %v235_v26  ;;  %v318_v36 = vmul.f32 3.8918573e-05, %v1522_v24 }
  0xb6   :  { %v625_v31 = vmul.f32 %v1529_v28, %v1529_v28  ;;  %v1537_v32 = vmul.f32 0.70710677, %v1532_v29  ;;  %v308_v33 = vadd.f32 0.00028619796, %v307_v27  ;;  %v319_v45 = vadd.f32 0.001143296, %v318_v36 }
  0xb7   :  { %v1606_v36 = vmul.f32 0.5, %v1515_v18  ;;  %v1619_v48 = vmul.f32 0.5, %v1532_v29 }
  0xb8   :  { %v1539_v34 = vmin.f32 %v625_v31, 16.0  ;;  %v345_v35 = vmul.f32 %v1537_v32, %v1537_v32  ;;  %v309_v41 = vmul.f32 %v308_v33, %v1522_v24  ;;  %v320_v53 = vmul.f32 %v319_v45, %v1522_v24 }
  0xb9   :  { %v255_v37 = vpop.f32.mrf.mxu2 }
  0xba   :  { %v1544_v39 = vmin.f32 %v345_v35, 16.0  ;;  %v1547_v40 = vadd.f32 %v1512_v16, %v255_v37  ;;  %v627_v42 = vmul.f32 2.1237322e-06, %v1539_v34  ;;  %v310_v49 = vadd.f32 0.0036580483, %v309_v41 }
  0xbb   :  { %v238_v43 = vpop.f32.mrf.mxu0  ;;  %v321_v63 = vadd.f32 0.014752088, %v320_v53  ;;  %v1609_v37 = vmul.f32 0.5, %v1525_v25 }
  0xbc   :  { %v347_v44 = vmul.f32 2.1237322e-06, %v1544_v39  ;;  %v1553_v46 = vmul.f32 0.70710677, %v1547_v40  ;;  %v1556_v47 = vadd.f32 %v1512_v16, %v238_v43  ;;  %v628_v50 = vadd.f32 0.00028619796, %v627_v42 }
  0xbd   :  { %v311_v59 = vmul.f32 %v310_v49, %v1522_v24  ;;  %v322_v10 = vmul.f32 %v321_v63, %v1522_v24 }
  0xbe   :  { %v1559_v51 = vmul.f32 0.70710677, %v1556_v47  ;;  %v348_v52 = vadd.f32 0.00028619796, %v347_v44  ;;  %v665_v54 = vmul.f32 %v1553_v46, %v1553_v46  ;;  %v629_v60 = vmul.f32 %v628_v50, %v1539_v34 }
  0xbf   :  { %v312_v5 = vadd.f32 0.05243302, %v311_v59  ;;  %v323_v30 = vadd.f32 0.112945676, %v322_v10  ;;  %v1626_v50 = vmul.f32 0.5, %v1547_v40 }
  0xc0   :  { %v385_v55 = vmul.f32 %v1559_v51, %v1559_v51  ;;  %v349_v62 = vmul.f32 %v348_v52, %v1544_v39  ;;  %v1572_v0 = vmin.f32 %v665_v54, 16.0  ;;  %v630_v6 = vadd.f32 0.0036580483, %v629_v60 }
  0xc1   :  { %v258_v56 = vpop.f32.mrf.mxu2  ;;  %v313_v21 = vmul.f32 %v312_v5, %v1522_v24  ;;  %v324_v25 = vmul.f32 %v323_v30, %v1522_v24 }
  0xc2   :  { %v1567_v58 = vadd.f32 %v1512_v16, %v258_v56  ;;  %v1574_v1 = vmin.f32 %v385_v55, 16.0  ;;  %v350_v8 = vadd.f32 0.0036580483, %v349_v62  ;;  %v667_v11 = vmul.f32 2.1237322e-06, %v1572_v0 }
  0xc3   :  { %v240_v61 = vpop.f32.mrf.mxu0  ;;  %v631_v22 = vmul.f32 %v630_v6, %v1539_v34  ;;  %v314_v42 = vadd.f32 0.18741608, %v313_v21  ;;  %v1633_v56 = vmul.f32 0.5, %v1556_v47  ;;  %v325_v6 = vadd.f32 0.4994258, %v324_v25 }
  0xc4   :  { %v1577_v2 = vmul.f32 0.70710677, %v1567_v58  ;;  %v1580_v3 = vadd.f32 %v1512_v16, %v240_v61  ;;  %v387_v12 = vmul.f32 2.1237322e-06, %v1574_v1  ;;  %v351_v26 = vmul.f32 %v350_v8, %v1544_v39 }
  0xc5   :  { %v668_v31 = vadd.f32 0.00028619796, %v667_v11  ;;  %v632_v43 = vadd.f32 0.05243302, %v631_v22  ;;  %v315_v40 = vmul.f32 %v314_v42, %v1522_v24  ;;  %v1657_v22 = vmul.f32 0.5, %v1567_v58 }
  0xc6   :  { %v705_v7 = vmul.f32 %v1577_v2, %v1577_v2  ;;  %v1585_v9 = vmul.f32 0.70710677, %v1580_v3  ;;  %v388_v33 = vadd.f32 0.00028619796, %v387_v12  ;;  %v352_v18 = vadd.f32 0.05243302, %v351_v26 }
  0xc7   :  { %v669_v52 = vmul.f32 %v668_v31, %v1572_v0  ;;  %v633_v60 = vmul.f32 %v632_v43, %v1539_v34  ;;  %2192 = vst [vmem:[#allocation12_spill] sm:$0xff] %v1657_v22 }
  0xc8   :  { %v1590_v15 = vmin.f32 %v705_v7, 16.0  ;;  %v425_v17 = vmul.f32 %v1585_v9, %v1585_v9  ;;  %v389_v53 = vmul.f32 %v388_v33, %v1574_v1  ;;  %v353_v4 = vmul.f32 %v352_v18, %v1544_v39 }
  0xc9   :  { %v260_v13 = vpop.f32.mrf.mxu2  ;;  %v670_v7 = vadd.f32 0.0036580483, %v669_v52  ;;  %v634_v21 = vadd.f32 0.18741608, %v633_v60 }
  0xca   :  { %v1595_v19 = vadd.f32 %v1512_v16, %v260_v13  ;;  %v1600_v27 = vmin.f32 %v425_v17, 16.0  ;;  %v707_v38 = vmul.f32 2.1237322e-06, %v1590_v15  ;;  %v390_v8 = vadd.f32 0.0036580483, %v389_v53 }
  0xcb   :  { %v243_v23 = vpop.f32.mrf.mxu0  ;;  %v316_v17 = vadd.f32 1.1283791, %v315_v40  ;;  %v354_v26 = vadd.f32 0.18741608, %v353_v4  ;;  %v635_v53 = vmul.f32 %v634_v21, %v1539_v34 }
  0xcc   :  { %v1603_v35 = vmul.f32 0.70710677, %v1595_v19  ;;  %v1613_v41 = vadd.f32 %v1512_v16, %v243_v23  ;;  %v427_v44 = vmul.f32 2.1237322e-06, %v1600_v27  ;;  %v708_v29 = vadd.f32 0.00028619796, %v707_v38 }
  0xcd   :  { %v671_v38 = vmul.f32 %v670_v7, %v1572_v0  ;;  %v391_v42 = vmul.f32 %v390_v8, %v1574_v1  ;;  %v1695_v21 = vmul.f32 0.5, %v1595_v19 }
  0xce   :  { %v745_v45 = vmul.f32 %v1603_v35, %v1603_v35  ;;  %v1622_v49 = vmul.f32 0.70710677, %v1613_v41  ;;  %v428_v61 = vadd.f32 0.00028619796, %v427_v44  ;;  %v709_v11 = vmul.f32 %v708_v29, %v1590_v15 }
  0xcf   :  { %2194 = vst [vmem:[#allocation14_spill] sm:$0xff] %v1695_v21 }
  0xd0   :  { %v1630_v54 = vmin.f32 %v745_v45, 16.0  ;;  %v465_v57 = vmul.f32 %v1622_v49, %v1622_v49  ;;  %v429_v23 = vmul.f32 %v428_v61, %v1600_v27  ;;  %v326_v45 = vmul.f32 %v325_v6, %v1522_v24 }
  0xd1   :  { %v263_v55 = vpop.f32.mrf.mxu2  ;;  %v710_v58 = vadd.f32 0.0036580483, %v709_v11  ;;  %v355_v24 = vmul.f32 %v354_v26, %v1544_v39 }
  0xd2   :  { %v1638_v59 = vadd.f32 %v1512_v16, %v263_v55  ;;  %v747_v62 = vmul.f32 2.1237322e-06, %v1630_v54  ;;  %v1644_v5 = vmin.f32 %v465_v57, 16.0  ;;  %v1676_v55 = vmul.f32 0.5, %v1580_v3 }
  0xd3   :  { %v245_v63 = vpop.f32.mrf.mxu0  ;;  %v430_v29 = vadd.f32 0.0036580483, %v429_v23  ;;  %v1686_v7 = vadd.f32 1.0, %v326_v45  ;;  %v392_v3 = vadd.f32 0.05243302, %v391_v42  ;;  %v711_v8 = vmul.f32 %v710_v58, %v1590_v15 }
  0xd4   :  { %v1647_v47 = vmul.f32 0.70710677, %v1638_v59  ;;  %v748_v10 = vadd.f32 0.00028619796, %v747_v62  ;;  %v467_v12 = vmul.f32 2.1237322e-06, %v1644_v5  ;;  %v1654_v14 = vadd.f32 %v1512_v16, %v245_v63 }
  0xd5   :  { %v672_v63 = vadd.f32 0.05243302, %v671_v38  ;;  %v356_v26 = vadd.f32 1.1283791, %v355_v24  ;;  %1328 = vrcp.f32 %v1686_v7  ;;  %vm333_vm1 = vweird.f32 %v1686_v7 }
  0xd6   :  { %v785_v13 = vmul.f32 %v1647_v47, %v1647_v47  ;;  %v749_v30 = vmul.f32 %v748_v10, %v1630_v54  ;;  %v468_v31 = vadd.f32 0.00028619796, %v467_v12  ;;  %v1666_v43 = vmul.f32 0.70710677, %v1654_v14 }
  0xd7   :  { %v636_v12 = vadd.f32 1.1283791, %v635_v53  ;;  %v673_v19 = vmul.f32 %v672_v63, %v1572_v0 }
  0xd8   :  { %v1661_v33 = vmin.f32 %v785_v13, 16.0  ;;  %v469_v18 = vmul.f32 %v468_v31, %v1644_v5  ;;  %v505_v57 = vmul.f32 %v1666_v43, %v1666_v43  ;;  %v750_v60 = vadd.f32 0.0036580483, %v749_v30 }
  0xd9   :  { %v265_v44 = vpop.f32.mrf.mxu2  ;;  %v431_v13 = vmul.f32 %v430_v29, %v1600_v27 }
  0xda   :  { %v787_v25 = vmul.f32 2.1237322e-06, %v1661_v33  ;;  %v1672_v52 = vadd.f32 %v1512_v16, %v265_v44  ;;  %v470_v61 = vadd.f32 0.0036580483, %v469_v18  ;;  %v1681_v4 = vmin.f32 %v505_v57, 16.0 }
  0xdb   :  { %v248_v40 = vpop.f32.mrf.mxu0  ;;  %v751_v30 = vmul.f32 %v750_v60, %v1630_v54  ;;  %v393_v18 = vmul.f32 %v392_v3, %v1574_v1  ;;  %v432_v29 = vadd.f32 0.05243302, %v431_v13 }
  0xdc   :  { %v788_v62 = vadd.f32 0.00028619796, %v787_v25  ;;  %v1684_v6 = vadd.f32 %v1512_v16, %v248_v40  ;;  %v1691_v11 = vmul.f32 0.70710677, %v1672_v52  ;;  %v507_v23 = vmul.f32 2.1237322e-06, %v1681_v4 }
  0xdd   :  { %v471_v31 = vmul.f32 %v470_v61, %v1644_v5  ;;  %v712_v25 = vadd.f32 0.05243302, %v711_v8  ;;  %v1717_v61 = vmul.f32 %v316_v17, %v1518_v20  ;;  %v1732_v17 = vpop.eup %1328 }
  0xde   :  { %2193 = vst [vmem:[#allocation13_spill] sm:$0xff] %v1684_v6  ;;  %v789_v10 = vmul.f32 %v788_v62, %v1661_v33  ;;  %v825_v38 = vmul.f32 %v1691_v11, %v1691_v11  ;;  %v508_v44 = vadd.f32 0.00028619796, %v507_v23  ;;  %v1703_v45 = vmul.f32 0.70710677, %v1684_v6 }
  0xdf   :  { %v752_v62 = vadd.f32 0.05243302, %v751_v30  ;;  %v472_v63 = vadd.f32 0.05243302, %v471_v31  ;;  %v394_v30 = vadd.f32 0.18741608, %v393_v18  ;;  %v713_v31 = vmul.f32 %v712_v25, %v1590_v15 }
  0xe0   :  { %v790_v42 = vadd.f32 0.0036580483, %v789_v10  ;;  %2195 = vst [vmem:[#allocation15_spill] sm:$0xff] %v1703_v45  ;;  %v1708_v53 = vmin.f32 %v825_v38, 16.0  ;;  %v509_v57 = vmul.f32 %v508_v44, %v1681_v4  ;;  %v545_v40 = vmul.f32 %v1703_v45, %v1703_v45 }
  0xe1   :  { %v268_v58 = vpop.f32.mrf.mxu2  ;;  %v1727_v38 = vmul.f32 %v636_v12, %v1529_v28  ;;  %v674_v44 = vadd.f32 0.18741608, %v673_v19  ;;  %v473_v19 = vmul.f32 %v472_v63, %v1644_v5  ;;  %vm334_vm0 = vweird.f32 %v1732_v17 }
  0xe2   :  { %v1714_v24 = vadd.f32 %v1512_v16, %v268_v58  ;;  %v827_v3 = vmul.f32 2.1237322e-06, %v1708_v53  ;;  %v791_v8 = vmul.f32 %v790_v42, %v1661_v33  ;;  %v510_v10 = vadd.f32 0.0036580483, %v509_v57  ;;  %vm1819_vm2 = vmor %vm333_vm1, %vm334_vm0 }
  0xe3   :  { %v250_v60 = vpop.f32.mrf.mxu0  ;;  %v1721_v13 = vmin.f32 %v545_v40, 16.0  ;;  %v433_v40 = vmul.f32 %v432_v29, %v1600_v27  ;;  %v329_v29 = vmul.f32 %v1732_v17, %v1686_v7  ;;  %v474_v22 = vadd.f32 0.18741608, %v473_v19 }
  0xe4   :  { %2196 = vst [vmem:[#allocation16_spill] sm:$0xff] %v1714_v24  ;;  %v1724_v23 = vadd.f32 %v1512_v16, %v250_v60  ;;  %v828_v58 = vadd.f32 0.00028619796, %v827_v3  ;;  %v1730_v20 = vmul.f32 0.70710677, %v1714_v24  ;;  %v511_v42 = vmul.f32 %v510_v10, %v1681_v4 }
  0xe5   :  { %v547_v57 = vmul.f32 2.1237322e-06, %v1721_v13  ;;  %v753_v60 = vmul.f32 %v752_v62, %v1630_v54  ;;  %v792_v3 = vadd.f32 0.05243302, %v791_v8  ;;  %v675_v62 = vmul.f32 %v674_v44, %v1572_v0 }
  0xe6   :  { %2197 = vst [vmem:[#allocation17_spill] sm:$0xff] %v1724_v23  ;;  %v829_v28 = vmul.f32 %v828_v58, %v1708_v53  ;;  %v865_v12 = vmul.f32 %v1730_v20, %v1730_v20  ;;  %v1744_v18 = vmul.f32 0.70710677, %v1724_v23  ;;  %v512_v25 = vadd.f32 0.05243302, %v511_v42 }
  0xe7   :  { %2198 = vst [vmem:[#allocation18_spill] sm:$0xff] %v1730_v20  ;;  %v548_v24 = vadd.f32 0.00028619796, %v547_v57  ;;  %v395_v58 = vmul.f32 %v394_v30, %v1574_v1  ;;  %v1756_v8 = vmul.f32 %v356_v26, %v1537_v32  ;;  %v714_v42 = vadd.f32 0.18741608, %v713_v31 }
  0xe8   :  { %2199 = vst [vmem:[#allocation19_spill] sm:$0xff] %v1744_v18  ;;  %v830_v10 = vadd.f32 0.0036580483, %v829_v28  ;;  %v1746_v6 = vmin.f32 %v865_v12, 16.0  ;;  %v585_v63 = vmul.f32 %v1744_v18, %v1744_v18  ;;  %v434_v12 = vadd.f32 0.18741608, %v433_v40 }
  0xe9   :  { %v270_v21 = vpop.f32.mrf.mxu2  ;;  %v549_v20 = vmul.f32 %v548_v24, %v1721_v13  ;;  %v754_v23 = vadd.f32 0.18741608, %v753_v60  ;;  %v793_v30 = vmul.f32 %v792_v3, %v1661_v33  ;;  %v513_v24 = vmul.f32 %v512_v25, %v1681_v4 }
  0xea   :  { %v831_v57 = vmul.f32 %v830_v10, %v1708_v53  ;;  %v867_v28 = vmul.f32 2.1237322e-06, %v1746_v6  ;;  %v1761_v44 = vadd.f32 %v1512_v16, %v270_v21  ;;  %v1765_v18 = vmin.f32 %v585_v63, 16.0 }
  0xeb   :  { %v550_v45 = vadd.f32 0.0036580483, %v549_v20  ;;  %v676_v32 = vadd.f32 1.1283791, %v675_v62  ;;  %v396_v26 = vadd.f32 1.1283791, %v395_v58  ;;  %v715_v40 = vmul.f32 %v714_v42, %v1590_v15 }
  0xec   :  { %2200 = vst [vmem:[#allocation20_spill] sm:$0xff] %v1761_v44  ;;  %v1768_v31 = vmul.f32 0.5, %v1613_v41  ;;  %v330_v10 = vsub.f32 1.0, %v329_v29  ;;  %v1772_v60 = vmul.f32 0.5, %v1638_v59  ;;  %v832_v16 = vadd.f32 0.05243302, %v831_v57 }
  0xed   :  { %v868_v21 = vadd.f32 0.00028619796, %v867_v28  ;;  %v435_v19 = vmul.f32 %v434_v12, %v1600_v27  ;;  %v755_v3 = vmul.f32 %v754_v23, %v1630_v54  ;;  %v475_v20 = vmul.f32 %v474_v22, %v1644_v5 }
  0xee   :  { %2201 = vst [vmem:[#allocation21_spill] sm:$0xff] %v1772_v60  ;;  %v1778_v25 = vmul.f32 0.70710677, %v1761_v44  ;;  %v794_v62 = vadd.f32 0.18741608, %v793_v30  ;;  %v551_v29 = vmul.f32 %v550_v45, %v1721_v13  ;;  %v1783_v59 = vmul.f32 %v676_v32, %v1553_v46 }
  0xef   :  { %v514_v41 = vadd.f32 0.18741608, %v513_v24  ;;  %v587_v58 = vmul.f32 2.1237322e-06, %v1765_v18  ;;  %v1786_v63 = vmul.f32 %v396_v26, %v1559_v51  ;;  %v1789_v42 = vmul.f32 0.5, %v1654_v14 }
  0xf0   :  { %2202 = vst [vmem:[#allocation22_spill] sm:$0xff] %v1778_v25  ;;  %v331_v22 = vmul.f32 %v1732_v17, %v330_v10  ;;  %v716_v23 = vadd.f32 1.1283791, %v715_v40  ;;  %v833_v57 = vmul.f32 %v832_v16, %v1708_v53  ;;  %v869_v28 = vmul.f32 %v868_v21, %v1746_v6 }
  0xf1   :  { %2203 = vst [vmem:[#allocation23_spill] sm:$0xff] %v1789_v42  ;;  %v358_v45 = vmul.f32 3.8918573e-05, %v1544_v39  ;;  %v436_v12 = vadd.f32 1.1283791, %v435_v19  ;;  %v905_v46 = vmul.f32 %v1778_v25, %v1778_v25  ;;  %v795_v51 = vmul.f32 %v794_v62, %v1661_v33 }
  0xf2   :  { %v756_v30 = vadd.f32 1.1283791, %v755_v3  ;;  %v1795_v24 = vadd.f32 1.1283791, %v475_v20  ;;  %v515_v14 = vmul.f32 %v514_v41, %v1681_v4  ;;  %v552_v32 = vadd.f32 0.05243302, %v551_v29 }
  0xf3   :  { %v588_v26 = vadd.f32 0.00028619796, %v587_v58  ;;  %v332_v10 = vadd.f32 %v1732_v17, %v331_v22  ;;  %v337_v40 = vand.u32 2147483647, %v1686_v7  ;;  %v359_v16 = vadd.f32 0.001143296, %v358_v45 }
  0xf4   :  { %v1805_v21 = vmul.f32 0.5, %v1672_v52  ;;  %v834_v19 = vadd.f32 0.18741608, %v833_v57  ;;  %v870_v3 = vadd.f32 0.0036580483, %v869_v28  ;;  %v339_v20 = vand.u32 2147483648, %v1686_v7 }
  0xf5   :  { %v1808_v44 = vmin.f32 %v905_v46, 16.0  ;;  %v360_v62 = vmul.f32 %v359_v16, %v1544_v39  ;;  %v638_v41 = vmul.f32 3.8918573e-05, %v1539_v34  ;;  %v796_v29 = vadd.f32 1.1283791, %v795_v51 }
  0xf6   :  { %2204 = vst [vmem:[#allocation24_spill] sm:$0xff] %v1805_v21  ;;  %v1813_v58 = vadd.f32 1.1283791, %v515_v14  ;;  %v553_v22 = vmul.f32 %v552_v32, %v1721_v13  ;;  %v589_v52 = vmul.f32 %v588_v26, %v1765_v18  ;;  %v336_v7 = vsel %vm1819_vm2, %v1732_v17, %v332_v10 }
  0xf7   :  { %vm338_vm3 = vcmp.eq.f32.partialorder %v337_v40, 8.507059e+37  ;;  %v361_v28 = vadd.f32 0.014752088, %v360_v62  ;;  %v639_v45 = vadd.f32 0.001143296, %v638_v41  ;;  %v835_v46 = vmul.f32 %v834_v19, %v1708_v53 }
  0xf8   :  { %v871_v51 = vmul.f32 %v870_v3, %v1746_v6  ;;  %v340_v14 = vor.u32 1.1754944e-38, %v339_v20  ;;  %v678_v32 = vmul.f32 3.8918573e-05, %v1572_v0  ;;  %v907_v26 = vmul.f32 2.1237322e-06, %v1808_v44 }
  0xf9   :  { %v362_v16 = vmul.f32 %v361_v28, %v1544_v39  ;;  %v640_v25 = vmul.f32 %v639_v45, %v1539_v34  ;;  %v398_v21 = vmul.f32 3.8918573e-05, %v1574_v1  ;;  %v554_v57 = vadd.f32 0.18741608, %v553_v22 }
  0xfa   :  { %v590_v17 = vadd.f32 0.0036580483, %v589_v52  ;;  %v341_v10 = vsel %vm338_vm3, %v340_v14, %v336_v7  ;;  %v679_v40 = vadd.f32 0.001143296, %v678_v32  ;;  %v1834_v62 = vmul.f32 %v716_v23, %v1577_v2 }
  0xfb   :  { %v363_v19 = vadd.f32 0.112945676, %v362_v16  ;;  %v641_v3 = vadd.f32 0.014752088, %v640_v25  ;;  %v399_v20 = vadd.f32 0.001143296, %v398_v21  ;;  %v342_v42 = vmul.f32 %v341_v10, %v1717_v61 }
  0xfc   :  { %v1836_v41 = vadd.f32 1.1283791, %v835_v46  ;;  %v1838_v60 = vadd.f32 0.05243302, %v871_v51  ;;  %v680_v28 = vmul.f32 %v679_v40, %v1572_v0  ;;  %v438_v45 = vmul.f32 3.8918573e-05, %v1600_v27 }
  0xfd   :  { %v364_v22 = vmul.f32 %v363_v19, %v1544_v39  ;;  %v642_v52 = vmul.f32 %v641_v3, %v1539_v34  ;;  %v400_v2 = vmul.f32 %v399_v20, %v1574_v1  ;;  %v1847_v23 = vmul.f32 %v436_v12, %v1585_v9 }
  0xfe   :  { %2207 = vst [vmem:[#allocation25_spill] sm:$0xff] %v1838_v60  ;;  %v908_v25 = vadd.f32 0.00028619796, %v907_v26  ;;  %v681_v21 = vadd.f32 0.014752088, %v680_v28  ;;  %v1850_v46 = vmul.f32 %v756_v30, %v1603_v35  ;;  %v591_v61 = vmul.f32 %v590_v17, %v1765_v18 }
  0xff   :  { %v439_v7 = vadd.f32 0.001143296, %v438_v45  ;;  %v365_v51 = vadd.f32 0.4994258, %v364_v22  ;;  %v643_v14 = vadd.f32 0.112945676, %v642_v52  ;;  %v1861_v35 = vmul.f32 %v1795_v24, %v1622_v49 }
 0x100   :  { %v401_v32 = vadd.f32 0.014752088, %v400_v2  ;;  %v682_v16 = vmul.f32 %v681_v21, %v1572_v0  ;;  %v718_v40 = vmul.f32 3.8918573e-05, %v1590_v15  ;;  %v1230_v19 = vclamps-f32 %v342_v42, 1.0 }
 0x101   :  { %v440_v10 = vmul.f32 %v439_v7, %v1600_v27  ;;  %v366_v9 = vmul.f32 %v365_v51, %v1544_v39  ;;  %v644_v12 = vmul.f32 %v643_v14, %v1539_v34  ;;  %v758_v17 = vmul.f32 3.8918573e-05, %v1630_v54 }
 0x102   :  { %v402_v26 = vmul.f32 %v401_v32, %v1574_v1  ;;  %v683_v30 = vadd.f32 0.112945676, %v682_v16  ;;  %v1865_v20 = vmul.f32 %v796_v29, %v1647_v47  ;;  %v555_v39 = vmul.f32 %v554_v57, %v1721_v13 }
 0x103   :  { %v441_v3 = vadd.f32 0.014752088, %v440_v10  ;;  %v1867_v28 = vadd.f32 1.0, %v366_v9  ;;  %v645_v42 = vadd.f32 0.4994258, %v644_v12  ;;  %v909_v24 = vmul.f32 %v908_v25, %v1808_v44 }
 0x104   :  { %v403_v45 = vadd.f32 0.112945676, %v402_v26  ;;  %v684_v22 = vmul.f32 %v683_v30, %v1572_v0  ;;  %v719_v2 = vadd.f32 0.001143296, %v718_v40  ;;  %v592_v49 = vadd.f32 0.05243302, %v591_v61 }
 0x105   :  { %v442_v52 = vmul.f32 %v441_v3, %v1600_v27  ;;  %1330 = vrcp.f32 %v1867_v28  ;;  %v945_v21 = vadd.f32 1.0, %v1230_v19  ;;  %v646_v47 = vmul.f32 %v645_v42, %v1539_v34 }
 0x106   :  { %v685_v29 = vadd.f32 0.4994258, %v684_v22  ;;  %v404_v7 = vmul.f32 %v403_v45, %v1574_v1  ;;  %v377_v14 = vand.u32 2147483647, %v1867_v28  ;;  %v379_v57 = vand.u32 2147483648, %v1867_v28 }
 0x107   :  { %v443_v51 = vadd.f32 0.112945676, %v442_v52  ;;  %v720_v32 = vmul.f32 %v719_v2, %v1590_v15  ;;  %v759_v16 = vadd.f32 0.001143296, %v758_v17  ;;  %v1879_v10 = vadd.f32 1.0, %v646_v47 }
 0x108   :  { %v686_v25 = vmul.f32 %v685_v29, %v1572_v0  ;;  %v405_v61 = vadd.f32 0.4994258, %v404_v7  ;;  %v1885_v34 = vmul.f32 %v1813_v58, %v1666_v43  ;;  %v1887_v19 = vadd.f32 1.1283791, %v555_v39 }
 0x109   :  { %v444_v40 = vmul.f32 %v443_v51, %v1600_v27  ;;  %v1889_v9 = vadd.f32 0.0036580483, %v909_v24  ;;  %v721_v12 = vadd.f32 0.014752088, %v720_v32  ;;  %v1892_v26 = vmul.f32 %v592_v49, %v1765_v18 }
 0x10a   :  { %v1895_v30 = vmul.f32 %v945_v21, %v1606_v36  ;;  %1332 = vrcp.f32 %v1879_v10  ;;  %v760_v0 = vmul.f32 %v759_v16, %v1630_v54  ;;  %v1899_v17 = vadd.f32 1.0, %v686_v25 }
 0x10b   :  { %v1331_v3 = vpop.eup %1330  ;;  %v406_v43 = vmul.f32 %v405_v61, %v1574_v1  ;;  %v445_v58 = vadd.f32 0.4994258, %v444_v40  ;;  %v722_v42 = vmul.f32 %v721_v12, %v1590_v15  ;;  %vm373_vm4 = vweird.f32 %v1867_v28 }
 0x10c   :  { %v369_v45 = vmul.f32 %v1331_v3, %v1867_v28  ;;  %vm1905_vm5 = vcmp.eq.f32.partialorder %v377_v14, 8.507059e+37  ;;  %v380_v36 = vor.u32 1.1754944e-38, %v379_v57  ;;  %v657_v22 = vand.u32 2147483647, %v1879_v10 }
 0x10d   :  { %v659_v52 = vand.u32 2147483648, %v1879_v10  ;;  %1334 = vrcp.f32 %v1899_v17  ;;  %v478_v1 = vmul.f32 3.8918573e-05, %v1644_v5  ;;  %v1913_v49 = vadd.f32 1.0, %v406_v43 }
 0x10e   :  { %v370_v2 = vsub.f32 1.0, %v369_v45  ;;  %v446_v24 = vmul.f32 %v445_v58, %v1600_v27  ;;  %v723_v21 = vadd.f32 0.112945676, %v722_v42  ;;  %vm374_vm6 = vweird.f32 %v1331_v3 }
 0x10f   :  { %vm653_vm7 = vweird.f32 %v1879_v10  ;;  %v761_v47 = vadd.f32 0.014752088, %v760_v0  ;;  %v1918_v29 = vmul.f32 3.8918573e-05, %v1681_v4  ;;  %v697_v14 = vand.u32 2147483647, %v1899_v17  ;;  %vm375_vm10 = vmor %vm373_vm4, %vm374_vm6 }
 0x110   :  { %v1333_v7 = vpop.eup %1332  ;;  %v371_v51 = vmul.f32 %v1331_v3, %v370_v2  ;;  %v699_v57 = vand.u32 2147483648, %v1899_v17  ;;  %1336 = vrcp.f32 %v1913_v49  ;;  %vm1924_vm8 = vcmp.eq.f32.partialorder %v657_v22, 8.507059e+37 }
 0x111   :  { %v649_v32 = vmul.f32 %v1333_v7, %v1879_v10  ;;  %v660_v16 = vor.u32 1.1754944e-38, %v659_v52  ;;  %v1928_v25 = vadd.f32 1.0, %v446_v24  ;;  %vm693_vm9 = vweird.f32 %v1899_v17 }
 0x112   :  { %v372_v61 = vadd.f32 %v1331_v3, %v371_v51  ;;  %v724_v40 = vmul.f32 %v723_v21, %v1590_v15  ;;  %v762_v12 = vmul.f32 %v761_v47, %v1630_v54  ;;  %v417_v58 = vand.u32 2147483647, %v1913_v49 }
 0x113   :  { %v1335_v0 = vpop.eup %1334  ;;  %v650_v43 = vsub.f32 1.0, %v649_v32  ;;  %v419_v42 = vand.u32 2147483648, %v1913_v49  ;;  %1338 = vrcp.f32 %v1928_v25  ;;  %vm1940_vm11 = vcmp.eq.f32.partialorder %v697_v14, 8.507059e+37 }
 0x114   :  { %v376_v45 = vsel %vm375_vm10, %v1331_v3, %v372_v61  ;;  %v689_v22 = vmul.f32 %v1335_v0, %v1899_v17  ;;  %v700_v2 = vor.u32 1.1754944e-38, %v699_v57  ;;  %v479_v24 = vadd.f32 0.001143296, %v478_v1 }
 0x115   :  { %v381_v28 = vsel %vm1905_vm5, %v380_v36, %v376_v45  ;;  %v651_v21 = vmul.f32 %v1333_v7, %v650_v43  ;;  %vm654_vm12 = vweird.f32 %v1333_v7  ;;  %vm413_vm13 = vweird.f32 %v1913_v49 }
 0x116   :  { %v725_v47 = vadd.f32 0.4994258, %v724_v40  ;;  %v1337_v51 = vpop.eup %1336  ;;  %v382_v32 = vmul.f32 %v381_v28, %v1756_v8  ;;  %v690_v3 = vsub.f32 1.0, %v689_v22  ;;  %v457_v61 = vand.u32 2147483647, %v1928_v25  ;;  %vm655_vm0 = vmor %vm653_vm7, %vm654_vm12 }
 0x117   :  { %v763_v14 = vadd.f32 0.112945676, %v762_v12  ;;  %v652_v60 = vadd.f32 %v1333_v7, %v651_v21  ;;  %vm694_vm14 = vweird.f32 %v1335_v0  ;;  %v409_v57 = vmul.f32 %v1337_v51, %v1913_v49 }
 0x118   :  { %vm1950_vm15 = vcmp.eq.f32.partialorder %v417_v58, 8.507059e+37  ;;  %v420_v39 = vor.u32 1.1754944e-38, %v419_v42  ;;  %v1231_v36 = vclamps-f32 %v382_v32, 1.0  ;;  %v691_v40 = vmul.f32 %v1335_v0, %v690_v3  ;;  %vm695_vm3 = vmor %vm693_vm9, %vm694_vm14 }
 0x119   :  { %v726_v8 = vmul.f32 %v725_v47, %v1590_v15  ;;  %v764_v43 = vmul.f32 %v763_v14, %v1630_v54  ;;  %v1339_v45 = vpop.eup %1338  ;;  %v656_v12 = vsel %vm655_vm0, %v1333_v7, %v652_v60  ;;  %v410_v22 = vsub.f32 1.0, %v409_v57 }
 0x11a   :  { %vm453_vm1 = vweird.f32 %v1928_v25  ;;  %v459_v58 = vand.u32 2147483648, %v1928_v25  ;;  %v946_v28 = vadd.f32 1.0, %v1231_v36  ;;  %v661_v42 = vsel %vm1924_vm8, %v660_v16, %v656_v12 }
 0x11b   :  { %v692_v21 = vadd.f32 %v1335_v0, %v691_v40  ;;  %v449_v10 = vmul.f32 %v1339_v45, %v1928_v25  ;;  %vm1963_vm2 = vcmp.eq.f32.partialorder %v457_v61, 8.507059e+37  ;;  %v662_v15 = vmul.f32 %v661_v42, %v1727_v38 }
 0x11c   :  { %v411_v60 = vmul.f32 %v1337_v51, %v410_v22  ;;  %vm414_vm4 = vweird.f32 %v1337_v51  ;;  %v1971_v7 = vadd.f32 1.0, %v726_v8  ;;  %v962_v27 = vmul.f32 %v946_v28, %v1619_v48 }
 0x11d   :  { %v696_v16 = vsel %vm695_vm3, %v1335_v0, %v692_v21  ;;  %v450_v47 = vsub.f32 1.0, %v449_v10  ;;  %v765_v3 = vadd.f32 0.4994258, %v764_v43  ;;  %v1238_v14 = vclamps-f32 %v662_v15, 1.0  ;;  %vm415_vm5 = vmor %vm413_vm13, %vm414_vm4 }
 0x11e   :  { %v701_v61 = vsel %vm1940_vm11, %v700_v2, %v696_v16  ;;  %v412_v57 = vadd.f32 %v1337_v51, %v411_v60  ;;  %1340 = vrcp.f32 %v1971_v7  ;;  %v993_v38 = vpack.c.bf16 %v962_v27, %v1895_v30 }
 0x11f   :  { %v702_v17 = vmul.f32 %v701_v61, %v1783_v59  ;;  %v451_v36 = vmul.f32 %v1339_v45, %v450_v47  ;;  %vm454_vm6 = vweird.f32 %v1339_v45  ;;  %v953_v48 = vadd.f32 1.0, %v1238_v14 }
 0x120   :  { %v416_v0 = vsel %vm415_vm5, %v1337_v51, %v412_v57  ;;  %v480_v40 = vmul.f32 %v479_v24, %v1644_v5  ;;  %v519_v8 = vadd.f32 0.001143296, %v1918_v29  ;;  %1073 = vmatmul.bf16.vlgmr.msra.gmra.mxu1 %v993_v38  ;;  %v766_v30 = vmul.f32 %v765_v3, %v1630_v54  ;;  %vm455_vm7 = vmor %vm453_vm1, %vm454_vm6 }
 0x121   :  { %v1239_v52 = vclamps-f32 %v702_v17, 1.0  ;;  %v421_v2 = vsel %vm1950_vm15, %v420_v39, %v416_v0  ;;  %v452_v43 = vadd.f32 %v1339_v45, %v451_v36  ;;  %v460_v49 = vor.u32 1.1754944e-38, %v459_v58 }
 0x122   :  { %v422_v59 = vmul.f32 %v421_v2, %v1786_v63  ;;  %v737_v51 = vand.u32 2147483647, %v1971_v7  ;;  %v739_v24 = vand.u32 2147483648, %v1971_v7  ;;  %v969_v29 = vmul.f32 %v953_v48, %v1609_v37 }
 0x123   :  { %v954_v12 = vadd.f32 1.0, %v1239_v52  ;;  %v456_v22 = vsel %vm455_vm7, %v1339_v45, %v452_v43  ;;  %v1992_v28 = vadd.f32 1.0, %v766_v30  ;;  %v481_v63 = vadd.f32 0.014752088, %v480_v40 }
 0x124   :  { %v1341_v1 = vpop.eup %1340  ;;  %v1232_v39 = vclamps-f32 %v422_v59, 1.0  ;;  %v461_v54 = vsel %vm1963_vm2, %v460_v49, %v456_v22  ;;  %v520_v25 = vmul.f32 %v519_v8, %v1681_v4  ;;  %v798_v10 = vmul.f32 3.8918573e-05, %v1661_v33 }
 0x125   :  { %v970_v58 = vmul.f32 %v954_v12, %v1626_v50  ;;  %v462_v42 = vmul.f32 %v461_v54, %v1847_v23  ;;  %v729_v21 = vmul.f32 %v1341_v1, %v1971_v7  ;;  %vm733_vm8 = vweird.f32 %v1971_v7 }
 0x126   :  { %vm2002_vm9 = vcmp.eq.f32.partialorder %v737_v51, 8.507059e+37  ;;  %v740_v45 = vor.u32 1.1754944e-38, %v739_v24  ;;  %1342 = vrcp.f32 %v1992_v28  ;;  %v947_v60 = vadd.f32 1.0, %v1232_v39 }
 0x127   :  { %v997_v32 = vpack.c.bf16 %v970_v58, %v969_v29  ;;  %v1233_v15 = vclamps-f32 %v462_v42, 1.0  ;;  %v730_v27 = vsub.f32 1.0, %v729_v21  ;;  %vm734_vm10 = vweird.f32 %v1341_v1 }
 0x128   :  { %v777_v50 = vand.u32 2147483647, %v1992_v28  ;;  %v482_v23 = vmul.f32 %v481_v63, %v1644_v5  ;;  %v521_v16 = vadd.f32 0.014752088, %v520_v25  ;;  %v779_v14 = vand.u32 2147483648, %v1992_v28  ;;  %vm735_vm11 = vmor %vm733_vm8, %vm734_vm10 }
 0x129   :  { %1093 = vmatmul.bf16.vlgmr.msra.gmra.mxu3 %v997_v32  ;;  %v948_v47 = vadd.f32 1.0, %v1233_v15  ;;  %v731_v3 = vmul.f32 %v1341_v1, %v730_v27  ;;  %v799_v61 = vadd.f32 0.001143296, %v798_v10  ;;  %v838_v17 = vmul.f32 3.8918573e-05, %v1708_v53 }
 0x12a   :  { %v483_v57 = vadd.f32 0.112945676, %v482_v23  ;;  %v522_v38 = vmul.f32 %v521_v16, %v1681_v4  ;;  %v558_v36 = vmul.f32 3.8918573e-05, %v1721_v13  ;;  %v963_v48 = vmul.f32 %v947_v60, %v1633_v56 }
 0x12b   :  { %v964_v0 = vmul.f32 %v948_v47, %v1676_v55  ;;  %v732_v40 = vadd.f32 %v1341_v1, %v731_v3  ;;  %v800_v8 = vmul.f32 %v799_v61, %v1661_v33  ;;  %v839_v30 = vadd.f32 0.001143296, %v838_v17 }
 0x12c   :  { %v1343_v52 = vpop.eup %1342  ;;  %v484_v2 = vmul.f32 %v483_v57, %v1644_v5  ;;  %v523_v43 = vadd.f32 0.112945676, %v522_v38  ;;  %v559_v59 = vadd.f32 0.001143296, %v558_v36  ;;  %v598_v56 = vmul.f32 3.8918573e-05, %v1765_v18 }
 0x12d   :  { %v994_v49 = vpack.c.bf16 %v964_v0, %v963_v48  ;;  %v736_v51 = vsel %vm735_vm11, %v1341_v1, %v732_v40  ;;  %v769_v24 = vmul.f32 %v1343_v52, %v1992_v28  ;;  %v801_v22 = vadd.f32 0.014752088, %v800_v8 }
 0x12e   :  { %v741_v55 = vsel %vm2002_vm9, %v740_v45, %v736_v51  ;;  %v485_v12 = vadd.f32 0.4994258, %v484_v2  ;;  %v524_v29 = vmul.f32 %v523_v43, %v1681_v4  ;;  %vm774_vm12 = vweird.f32 %v1343_v52 }
 0x12f   :  { %v770_v7 = vsub.f32 1.0, %v769_v24  ;;  %v840_v39 = vmul.f32 %v839_v30, %v1708_v53  ;;  %v560_v54 = vmul.f32 %v559_v59, %v1721_v13  ;;  %v742_v63 = vmul.f32 %v741_v55, %v1834_v62  ;;  %v2221_v24 = vld [vmem:[#allocation12_spill] sm:$0xff] }
 0x130   :  { %v486_v1 = vmul.f32 %v485_v12, %v1644_v5  ;;  %v525_v25 = vadd.f32 0.4994258, %v524_v29  ;;  %v802_v58 = vmul.f32 %v801_v22, %v1661_v33  ;;  %1078 = vmatmul.bf16.gmra.mxu1 %v994_v49  ;;  %v599_v37 = vadd.f32 0.001143296, %v598_v56 }
 0x131   :  { %v771_v42 = vmul.f32 %v1343_v52, %v770_v7  ;;  %v841_v21 = vadd.f32 0.014752088, %v840_v39  ;;  %v561_v10 = vadd.f32 0.014752088, %v560_v54  ;;  %v594_v45 = vadd.f32 0.18741608, %v1892_v26 }
 0x132   :  { %v2031_v32 = vadd.f32 1.0, %v486_v1  ;;  %v526_v15 = vmul.f32 %v525_v25, %v1681_v4  ;;  %v803_v60 = vadd.f32 0.112945676, %v802_v58  ;;  %vm773_vm13 = vweird.f32 %v1992_v28  ;;  %v2222_v7 = vld [vmem:[#allocation14_spill] sm:$0xff] }
 0x133   :  { %v772_v27 = vadd.f32 %v1343_v52, %v771_v42  ;;  %vm778_vm14 = vcmp.eq.f32.partialorder %v777_v50, 8.507059e+37  ;;  %v842_v5 = vmul.f32 %v841_v21, %v1708_v53  ;;  %v1240_v62 = vclamps-f32 %v742_v63, 1.0  ;;  %vm775_vm15 = vmor %vm773_vm13, %vm774_vm12  ;;  %v2220_v50 = vld [vmem:[#allocation15_spill] sm:$0xff] }
 0x134   :  { %v780_v23 = vor.u32 1.1754944e-38, %v779_v14  ;;  %1344 = vrcp.f32 %v2031_v32  ;;  %v562_v16 = vmul.f32 %v561_v10, %v1721_v13  ;;  %v2039_v47 = vadd.f32 1.0, %v526_v15 }
 0x135   :  { %v776_v26 = vsel %vm775_vm15, %v1343_v52, %v772_v27  ;;  %v804_v4 = vmul.f32 %v803_v60, %v1661_v33  ;;  %v600_v3 = vmul.f32 %v599_v37, %v1765_v18  ;;  %v2045_v28 = vmul.f32 %v1836_v41, %v1691_v11 }
 0x136   :  { %v2049_v61 = vmul.f32 %v1887_v19, %v2220_v50  ;;  %v781_v14 = vsel %vm778_vm14, %v780_v23, %v776_v26  ;;  %v843_v57 = vadd.f32 0.112945676, %v842_v5  ;;  %v2052_v38 = vmul.f32 %v594_v45, %v1765_v18 }
 0x137   :  { %v2056_v17 = vmul.f32 %v1889_v9, %v1808_v44  ;;  %v782_v36 = vmul.f32 %v781_v14, %v1850_v46  ;;  %1346 = vrcp.f32 %v2039_v47  ;;  %v955_v48 = vadd.f32 1.0, %v1240_v62 }
 0x138   :  { %v805_v11 = vadd.f32 0.4994258, %v804_v4  ;;  %v844_v41 = vmul.f32 %v843_v57, %v1708_v53  ;;  %v563_v0 = vadd.f32 0.112945676, %v562_v16  ;;  %vm493_vm0 = vweird.f32 %v2031_v32 }
 0x139   :  { %v1241_v19 = vclamps-f32 %v782_v36, 1.0  ;;  %v601_v40 = vadd.f32 0.014752088, %v600_v3  ;;  %v878_v8 = vmul.f32 3.8918573e-05, %v1746_v6  ;;  %v499_v49 = vand.u32 2147483648, %v2031_v32 }
 0x13a   :  { %v1345_v52 = vpop.eup %1344  ;;  %v497_v2 = vand.u32 2147483647, %v2031_v32  ;;  %v806_v9 = vmul.f32 %v805_v11, %v1661_v33  ;;  %v845_v43 = vadd.f32 0.4994258, %v844_v41  ;;  %v564_v46 = vmul.f32 %v563_v0, %v1721_v13 }
 0x13b   :  { %v956_v30 = vadd.f32 1.0, %v1241_v19  ;;  %v489_v59 = vmul.f32 %v1345_v52, %v2031_v32  ;;  %v602_v51 = vmul.f32 %v601_v40, %v1765_v18  ;;  %v971_v56 = vmul.f32 %v955_v48, %v2221_v24 }
 0x13c   :  { %v2070_v55 = vadd.f32 1.0, %v806_v9  ;;  %v846_v12 = vmul.f32 %v845_v43, %v1708_v53  ;;  %v565_v29 = vadd.f32 0.4994258, %v564_v46  ;;  %v879_v63 = vadd.f32 0.001143296, %v878_v8 }
 0x13d   :  { %v1347_v22 = vpop.eup %1346  ;;  %v972_v33 = vmul.f32 %v956_v30, %v2222_v7  ;;  %v490_v39 = vsub.f32 1.0, %v489_v59  ;;  %v603_v54 = vadd.f32 0.112945676, %v602_v51  ;;  %vm2074_vm1 = vcmp.eq.f32.partialorder %v497_v2, 8.507059e+37 }
 0x13e   :  { %v529_v25 = vmul.f32 %v1347_v22, %v2039_v47  ;;  %v537_v58 = vand.u32 2147483647, %v2039_v47  ;;  %1348 = vrcp.f32 %v2070_v55  ;;  %vm494_vm2 = vweird.f32 %v1345_v52 }
 0x13f   :  { %v998_v42 = vpack.c.bf16 %v972_v33, %v971_v56  ;;  %v491_v21 = vmul.f32 %v1345_v52, %v490_v39  ;;  %v539_v53 = vand.u32 2147483648, %v2039_v47  ;;  %v2082_v37 = vadd.f32 1.0, %v846_v12  ;;  %vm495_vm4 = vmor %vm493_vm0, %vm494_vm2 }
 0x140   :  { %v530_v10 = vsub.f32 1.0, %v529_v25  ;;  %v566_v45 = vmul.f32 %v565_v29, %v1721_v13  ;;  %v604_v15 = vmul.f32 %v603_v54, %v1765_v18  ;;  %v500_v27 = vor.u32 1.1754944e-38, %v499_v49 }
 0x141   :  { %1098 = vmatmul.bf16.gmra.mxu3 %v998_v42  ;;  %v492_v60 = vadd.f32 %v1345_v52, %v491_v21  ;;  %vm533_vm3 = vweird.f32 %v2039_v47  ;;  %v880_v5 = vmul.f32 %v879_v63, %v1746_v6  ;;  %vm534_vm5 = vweird.f32 %v1347_v22 }
 0x142   :  { %v531_v62 = vmul.f32 %v1347_v22, %v530_v10  ;;  %v817_v23 = vand.u32 2147483647, %v2070_v55  ;;  %1350 = vrcp.f32 %v2082_v37  ;;  %vm2092_vm6 = vcmp.eq.f32.partialorder %v537_v58, 8.507059e+37  ;;  %vm535_vm7 = vmor %vm533_vm3, %vm534_vm5  ;;  %v2231_v58 = vld [vmem:[#allocation23_spill] sm:$0xff] }
 0x143   :  { %v496_v16 = vsel %vm495_vm4, %v1345_v52, %v492_v60  ;;  %v540_v26 = vor.u32 1.1754944e-38, %v539_v53  ;;  %v2096_v4 = vadd.f32 1.0, %v566_v45  ;;  %v605_v14 = vadd.f32 0.4994258, %v604_v15 }
 0x144   :  { %v1349_v3 = vpop.eup %1348  ;;  %v501_v50 = vsel %vm2074_vm1, %v500_v27, %v496_v16  ;;  %v532_v32 = vadd.f32 %v1347_v22, %v531_v62  ;;  %v881_v57 = vadd.f32 0.014752088, %v880_v5  ;;  %v819_v11 = vand.u32 2147483648, %v2070_v55 }
 0x145   :  { %v502_v36 = vmul.f32 %v501_v50, %v1861_v35  ;;  %v809_v48 = vmul.f32 %v1349_v3, %v2070_v55  ;;  %v918_v41 = vmul.f32 3.8918573e-05, %v1808_v44  ;;  %vm813_vm8 = vweird.f32 %v2070_v55 }
 0x146   :  { %v536_v0 = vsel %vm535_vm7, %v1347_v22, %v532_v32  ;;  %vm2107_vm9 = vcmp.eq.f32.partialorder %v817_v23, 8.507059e+37  ;;  %1352 = vrcp.f32 %v2096_v4  ;;  %v857_v8 = vand.u32 2147483647, %v2082_v37 }
 0x147   :  { %v1234_v40 = vclamps-f32 %v502_v36, 1.0  ;;  %v541_v35 = vsel %vm2092_vm6, %v540_v26, %v536_v0  ;;  %v810_v47 = vsub.f32 1.0, %v809_v48  ;;  %v859_v9 = vand.u32 2147483648, %v2082_v37 }
 0x148   :  { %v1351_v52 = vpop.eup %1350  ;;  %v542_v2 = vmul.f32 %v541_v35, %v1885_v34  ;;  %v606_v43 = vmul.f32 %v605_v14, %v1765_v18  ;;  %v882_v46 = vmul.f32 %v881_v57, %v1746_v6  ;;  %vm814_vm10 = vweird.f32 %v1349_v3 }
 0x149   :  { %v811_v30 = vmul.f32 %v1349_v3, %v810_v47  ;;  %v820_v59 = vor.u32 1.1754944e-38, %v819_v11  ;;  %v849_v49 = vmul.f32 %v1351_v52, %v2082_v37  ;;  %v949_v24 = vadd.f32 1.0, %v1234_v40  ;;  %vm815_vm13 = vmor %vm813_vm8, %vm814_vm10 }
 0x14a   :  { %v1235_v51 = vclamps-f32 %v542_v2, 1.0  ;;  %vm853_vm11 = vweird.f32 %v2082_v37  ;;  %v2121_v56 = vadd.f32 1.0, %v606_v43  ;;  %vm2123_vm12 = vcmp.eq.f32.partialorder %v857_v8, 8.507059e+37 }
 0x14b   :  { %v812_v12 = vadd.f32 %v1349_v3, %v811_v30  ;;  %v850_v29 = vsub.f32 1.0, %v849_v49  ;;  %v883_v18 = vadd.f32 0.112945676, %v882_v46  ;;  %v860_v33 = vor.u32 1.1754944e-38, %v859_v9  ;;  %v2233_v9 = vld [vmem:[#allocation21_spill] sm:$0xff]  ;;  %v2234_v46 = vld [vmem:[#allocation24_spill] sm:$0xff] }
 0x14c   :  { %v1353_v22 = vpop.eup %1352  ;;  %v950_v7 = vadd.f32 1.0, %v1235_v51  ;;  %1354 = vrcp.f32 %v2121_v56  ;;  %v919_v39 = vadd.f32 0.001143296, %v918_v41  ;;  %vm854_vm14 = vweird.f32 %v1351_v52  ;;  %v2235_v51 = vld [vmem:[#allocation19_spill] sm:$0xff] }
 0x14d   :  { %v816_v54 = vsel %vm815_vm13, %v1349_v3, %v812_v12  ;;  %v851_v63 = vmul.f32 %v1351_v52, %v850_v29  ;;  %v569_v1 = vmul.f32 %v1353_v22, %v2096_v4  ;;  %v965_v25 = vmul.f32 %v949_v24, %v1768_v31  ;;  %vm855_vm15 = vmor %vm853_vm11, %vm854_vm14 }
 0x14e   :  { %v966_v42 = vmul.f32 %v950_v7, %v2231_v58  ;;  %v821_v21 = vsel %vm2107_vm9, %v820_v59, %v816_v54  ;;  %v577_v53 = vand.u32 2147483647, %v2096_v4  ;;  %v884_v15 = vmul.f32 %v883_v18, %v1746_v6 }
 0x14f   :  { %v822_v55 = vmul.f32 %v821_v21, %v1865_v20  ;;  %v852_v10 = vadd.f32 %v1351_v52, %v851_v63  ;;  %v570_v45 = vsub.f32 1.0, %v569_v1  ;;  %vm574_vm0 = vweird.f32 %v1353_v22 }
 0x150   :  { %v995_v60 = vpack.c.bf16 %v966_v42, %v965_v25  ;;  %v579_v31 = vand.u32 2147483648, %v2096_v4  ;;  %v920_v27 = vmul.f32 %v919_v39, %v1808_v44  ;;  %v885_v16 = vadd.f32 0.4994258, %v884_v15  ;;  %v2236_v42 = vld [vmem:[#allocation13_spill] sm:$0xff] }
 0x151   :  { %v1242_v5 = vclamps-f32 %v822_v55, 1.0  ;;  %v856_v62 = vsel %vm855_vm15, %v1351_v52, %v852_v10  ;;  %v571_v23 = vmul.f32 %v1353_v22, %v570_v45  ;;  %v596_v20 = vadd.f32 1.1283791, %v2052_v38  ;;  %v2232_v52 = vld [vmem:[#allocation25_spill] sm:$0xff] }
 0x152   :  { %v1355_v13 = vpop.eup %1354  ;;  %1083 = vmatmul.bf16.gmra.mxu1 %v995_v60  ;;  %v861_v26 = vsel %vm2123_vm12, %v860_v33, %v856_v62  ;;  %vm573_vm1 = vweird.f32 %v2096_v4  ;;  %v921_v37 = vadd.f32 0.014752088, %v920_v27  ;;  %vm578_vm2 = vcmp.eq.f32.partialorder %v577_v53, 8.507059e+37  ;;  %v2237_v53 = vld [vmem:[#allocation17_spill] sm:$0xff] }
 0x153   :  { %v862_v3 = vmul.f32 %v861_v26, %v2045_v28  ;;  %v572_v50 = vadd.f32 %v1353_v22, %v571_v23  ;;  %v609_v32 = vmul.f32 %v1355_v13, %v2121_v56  ;;  %vm575_vm3 = vmor %vm573_vm1, %vm574_vm0  ;;  %v580_v14 = vor.u32 1.1754944e-38, %v579_v31 }
 0x154   :  { %v617_v57 = vand.u32 2147483647, %v2121_v56  ;;  %v886_v38 = vmul.f32 %v885_v16, %v1746_v6  ;;  %v922_v36 = vmul.f32 %v921_v37, %v1808_v44  ;;  %v957_v11 = vadd.f32 1.0, %v1242_v5 }
 0x155   :  { %v1243_v48 = vclamps-f32 %v862_v3, 1.0  ;;  %v576_v41 = vsel %vm575_vm3, %v1353_v22, %v572_v50  ;;  %v610_v4 = vsub.f32 1.0, %v609_v32  ;;  %v619_v28 = vand.u32 2147483648, %v2121_v56 }
 0x156   :  { %v581_v0 = vsel %vm578_vm2, %v580_v14, %v576_v41  ;;  %v887_v19 = vadd.f32 1.0, %v886_v38  ;;  %v923_v40 = vadd.f32 0.112945676, %v922_v36  ;;  %vm614_vm4 = vweird.f32 %v1355_v13  ;;  %v2238_v14 = vld [vmem:[#allocation18_spill] sm:$0xff] }
 0x157   :  { %v958_v35 = vadd.f32 1.0, %v1243_v48  ;;  %v582_v47 = vmul.f32 %v581_v0, %v2049_v61  ;;  %v611_v8 = vmul.f32 %v1355_v13, %v610_v4  ;;  %v873_v2 = vmul.f32 %v2232_v52, %v1746_v6 }
 0x158   :  { %vm613_vm5 = vweird.f32 %v2121_v56  ;;  %1356 = vrcp.f32 %v887_v19  ;;  %v973_v43 = vmul.f32 %v957_v11, %v2233_v9  ;;  %v924_v49 = vmul.f32 %v923_v40, %v1808_v44  ;;  %v2240_v9 = vld [vmem:[#allocation16_spill] sm:$0xff] }
 0x159   :  { %v974_v30 = vmul.f32 %v958_v35, %v2234_v46  ;;  %v612_v59 = vadd.f32 %v1355_v13, %v611_v8  ;;  %v597_v24 = vmul.f32 %v596_v20, %v2235_v51  ;;  %v912_v12 = vadd.f32 0.05243302, %v2056_v17  ;;  %vm615_vm6 = vmor %vm613_vm5, %vm614_vm4  ;;  %v2241_v46 = vld [vmem:[#allocation20_spill] sm:$0xff] }
 0x15a   :  { %vm618_vm7 = vcmp.eq.f32.partialorder %v617_v57, 8.507059e+37  ;;  %v620_v61 = vor.u32 1.1754944e-38, %v619_v28  ;;  %v1236_v34 = vclamps-f32 %v582_v47, 1.0  ;;  %v925_v22 = vadd.f32 0.4994258, %v924_v49 }
 0x15b   :  { %v999_v29 = vpack.c.bf16 %v974_v30, %v973_v43  ;;  %v616_v18 = vsel %vm615_vm6, %v1355_v13, %v612_v59  ;;  %v874_v54 = vadd.f32 0.18741608, %v873_v2  ;;  %v913_v63 = vmul.f32 %v912_v12, %v1808_v44  ;;  %v1327_v12 = vld [vmem:[%s2182_s4] ss:$0 sm:$0xff]  ;;  %s1467_s4 = smov [#allocation8]  }
 0x15c   :  { %v621_v56 = vsel %vm618_vm7, %v620_v61, %v616_v18  ;;  %v926_v33 = vmul.f32 %v925_v22, %v1808_v44  ;;  %v951_v25 = vadd.f32 1.0, %v1236_v34  ;;  %v279_v21 = vmul.f32 0.5, %v2236_v42  ;;  %s1150_s10 = sshll.u32 %s1467_s4, 4  ;;  %s1151_s10 = int_to_ptr.vmem [resolvable:$true] %s1150_s10 }
 0x15d   :  { %1103 = vmatmul.bf16.gmra.mxu3 %v999_v29  ;;  %v622_v7 = vmul.f32 %v621_v56, %v597_v24  ;;  %v280_v55 = vmul.f32 0.5, %v2237_v53  ;;  %v875_v15 = vmul.f32 %v874_v54, %v1746_v6  ;;  %v914_v60 = vadd.f32 0.18741608, %v913_v63 }
 0x15e   :  { %v1357_v39 = vpop.eup %1356  ;;  %v927_v17 = vadd.f32 1.0, %v926_v33  ;;  %v899_v31 = vand.u32 2147483648, %v887_v19  ;;  %v967_v27 = vmul.f32 %v951_v25, %v279_v21  ;;  %v897_v23 = vand.u32 2147483647, %v887_v19 }
 0x15f   :  { %v1237_v1 = vclamps-f32 %v622_v7, 1.0  ;;  %v889_v58 = vmul.f32 %v1357_v39, %v887_v19  ;;  %vm894_vm8 = vweird.f32 %v1357_v39  ;;  %vm893_vm9 = vweird.f32 %v887_v19 }
 0x160   :  { %1358 = vrcp.f32 %v927_v17  ;;  %v876_v20 = vadd.f32 1.1283791, %v875_v15  ;;  %vm895_vm10 = vmor %vm893_vm9, %vm894_vm8  ;;  %v915_v37 = vmul.f32 %v914_v60, %v1808_v44  ;;  %v900_v50 = vor.u32 1.1754944e-38, %v899_v31  ;;  %v2239_v44 = vld [vmem:[#allocation22_spill] sm:$0xff] }
 0x161   :  { %v952_v10 = vadd.f32 1.0, %v1237_v1  ;;  %v890_v45 = vsub.f32 1.0, %v889_v58  ;;  %vm898_vm11 = vcmp.eq.f32.partialorder %v897_v23, 8.507059e+37  ;;  %v939_v48 = vand.u32 2147483648, %v927_v17 }
 0x162   :  { %v877_v57 = vmul.f32 %v876_v20, %v2238_v14  ;;  %v916_v36 = vadd.f32 1.1283791, %v915_v37  ;;  %v937_v4 = vand.u32 2147483647, %v927_v17  ;;  %vm933_vm13 = vweird.f32 %v927_v17 }
 0x163   :  { %v968_v5 = vmul.f32 %v952_v10, %v280_v55  ;;  %v891_v62 = vmul.f32 %v1357_v39, %v890_v45  ;;  %v940_v28 = vor.u32 1.1754944e-38, %v939_v48  ;;  %v287_v43 = vmul.f32 0.5, %v2240_v9 }
 0x164   :  { %v917_v19 = vmul.f32 %v916_v36, %v2239_v44  ;;  %vm938_vm15 = vcmp.eq.f32.partialorder %v937_v4, 8.507059e+37  ;;  %v288_v30 = vmul.f32 0.5, %v2241_v46 }
 0x165   :  { %v996_v16 = vpack.c.bf16 %v968_v5, %v967_v27  ;;  %v892_v13 = vadd.f32 %v1357_v39, %v891_v62 }
 0x166   :  { %v1359_v26 = vpop.eup %1358 }
 0x167   :  { %1088 = vmatmul.bf16.gmra.mxu1 %v996_v16  ;;  %v896_v3 = vsel %vm895_vm10, %v1357_v39, %v892_v13  ;;  %v929_v6 = vmul.f32 %v1359_v26, %v927_v17  ;;  %vm934_vm12 = vweird.f32 %v1359_v26 }
 0x168   :  { %v901_v32 = vsel %vm898_vm11, %v900_v50, %v896_v3  ;;  %vm935_vm14 = vmor %vm933_vm13, %vm934_vm12 }
 0x169   :  { %v930_v38 = vsub.f32 1.0, %v929_v6  ;;  %v902_v11 = vmul.f32 %v901_v32, %v877_v57 }
 0x16b   :  { %v931_v41 = vmul.f32 %v1359_v26, %v930_v38  ;;  %v1244_v40 = vclamps-f32 %v902_v11, 1.0 }
 0x16d   :  { %v932_v0 = vadd.f32 %v1359_v26, %v931_v41  ;;  %v959_v2 = vadd.f32 1.0, %v1244_v40 }
 0x16f   :  { %v936_v35 = vsel %vm935_vm14, %v1359_v26, %v932_v0  ;;  %v975_v49 = vmul.f32 %v959_v2, %v287_v43 }
 0x170   :  { %v941_v47 = vsel %vm938_vm15, %v940_v28, %v936_v35 }
 0x171   :  { %v942_v8 = vmul.f32 %v941_v47, %v917_v19 }
 0x173   :  { %v1245_v52 = vclamps-f32 %v942_v8, 1.0 }
 0x175   :  { %v960_v59 = vadd.f32 1.0, %v1245_v52 }
 0x177   :  { %v976_v51 = vmul.f32 %v960_v59, %v288_v30 }
 0x179   :  { %v1000_v24 = vpack.c.bf16 %v976_v51, %v975_v49 }
 0x17b   :  { %1108 = vmatmul.bf16.gmra.mxu3 %v1000_v24 }
 0x19d   :  { %v1074_v61 = vpop.f32.mrf.mxu1 }
 0x19e   :  { %v1114_v29 = vadd.f32 %v1327_v12, %v1074_v61 }
 0x1a0   :  { %1130 = vst [vmem:[#allocation8] sm:$0xff] %v1114_v29 }
 0x1a5   :  { %v1076_v34 = vpop.f32.mrf.mxu1 }
 0x1a6   :  { %v1115_v18 = vadd.f32 %v1327_v12, %v1076_v34 }
 0x1a8   :  { %1131 = vst [vmem:[#allocation8 + $0x8] sm:$0xff] %v1115_v18 }
 0x1ac   :  { %v1094_v22 = vpop.f32.mrf.mxu3 }
 0x1ad   :  { %v1122_v56 = vadd.f32 %v1327_v12, %v1094_v22  ;;  %v1079_v7 = vpop.f32.mrf.mxu1 }
 0x1ae   :  { %v1116_v33 = vadd.f32 %v1327_v12, %v1079_v7 }
 0x1af   :  { %1138 = vst [vmem:[#allocation8 + $0x40] sm:$0xff] %v1122_v56 }
 0x1b0   :  { %1132 = vst [vmem:[#allocation8 + $0x10] sm:$0xff] %v1116_v33 }
 0x1b4   :  { %v1096_v39 = vpop.f32.mrf.mxu3 }
 0x1b5   :  { %v1123_v54 = vadd.f32 %v1327_v12, %v1096_v39  ;;  %v1081_v63 = vpop.f32.mrf.mxu1 }
 0x1b6   :  { %v1117_v1 = vadd.f32 %v1327_v12, %v1081_v63 }
 0x1b7   :  { %1139 = vst [vmem:[#allocation8 + $0x48] sm:$0xff] %v1123_v54 }
 0x1b8   :  { %1133 = vst [vmem:[#allocation8 + $0x18] sm:$0xff] %v1117_v1 }
 0x1c4   :  { %v1099_v25 = vpop.f32.mrf.mxu3 }
 0x1c5   :  { %v1124_v58 = vadd.f32 %v1327_v12, %v1099_v25 }
 0x1c7   :  { %1140 = vst [vmem:[#allocation8 + $0x50] sm:$0xff] %v1124_v58 }
 0x1cc   :  { %v1101_v17 = vpop.f32.mrf.mxu3 }
 0x1cd   :  { %v1125_v42 = vadd.f32 %v1327_v12, %v1101_v17 }
 0x1cf   :  { %v1084_v21 = vpop.f32.mrf.mxu1  ;;  %1141 = vst [vmem:[#allocation8 + $0x58] sm:$0xff] %v1125_v42 }
 0x1d0   :  { %v1118_v53 = vadd.f32 %v1327_v12, %v1084_v21 }
 0x1d2   :  { %1134 = vst [vmem:[#allocation8 + $0x20] sm:$0xff] %v1118_v53 }
 0x1d7   :  { %v1086_v55 = vpop.f32.mrf.mxu1 }
 0x1d8   :  { %v1119_v10 = vadd.f32 %v1327_v12, %v1086_v55 }
 0x1da   :  { %1135 = vst [vmem:[#allocation8 + $0x28] sm:$0xff] %v1119_v10 }
 0x1e0   :  { %v1104_v45 = vpop.f32.mrf.mxu3 }
 0x1e1   :  { %v1126_v15 = vadd.f32 %v1327_v12, %v1104_v45 }
 0x1e3   :  { %1142 = vst [vmem:[#allocation8 + $0x60] sm:$0xff] %v1126_v15 }
 0x1e4   :  { %v1089_v60 = vpop.f32.mrf.mxu1 }
 0x1e5   :  { %v1120_v31 = vadd.f32 %v1327_v12, %v1089_v60 }
 0x1e7   :  { %1136 = vst [vmem:[#allocation8 + $0x30] sm:$0xff] %v1120_v31 }
 0x1e8   :  { %v1106_v27 = vpop.f32.mrf.mxu3 }
 0x1e9   :  { %v1127_v5 = vadd.f32 %v1327_v12, %v1106_v27 }
 0x1eb   :  { %1143 = vst [vmem:[#allocation8 + $0x68] sm:$0xff] %v1127_v5 }
 0x1ec   :  { %v1091_v62 = vpop.f32.mrf.mxu1 }
 0x1ed   :  { %v1121_v23 = vadd.f32 %v1327_v12, %v1091_v62 }
 0x1ef   :  { %1137 = vst [vmem:[#allocation8 + $0x38] sm:$0xff] %v1121_v23 }
 0x1fe   :  { %v1109_v16 = vpop.f32.mrf.mxu3 }
 0x1ff   :  { %v1128_v13 = vadd.f32 %v1327_v12, %v1109_v16 }
 0x201   :  { %1144 = vst [vmem:[#allocation8 + $0x70] sm:$0xff] %v1128_v13 }
 0x206   :  { %v1111_v20 = vpop.f32.mrf.mxu3 }
 0x207   :  { %v1129_v26 = vadd.f32 %v1327_v12, %v1111_v20 }
 0x209   :  { %1145 = vst [vmem:[#allocation8 + $0x78] sm:$0xff] %v1129_v26 }
 0x20a   :  { %1158 = dma.vmem_to_hbm [thread:$0]  %s1151_s10, 2048, %s1153_s13, [#allocation4], %s1468_s14, %s1468_s14, %s1469_s15  }
 0x20b   :  { %1460 = dma.done.wait [#allocation4], 2048  }
 0x20c   :  { %1461 = vsyncadd [#allocation4], 4294965248 }
 0x20d   :  { %1163 = vsyncpa [#allocation3], 1 }
 0x20e   :  { %1164 = vsyncpa [#allocation6], 1 }
 0x20f   :  { %1165 = vsyncpa [#allocation4], 1 }

</bundles_post_ra>
